<compile_context>
chip_gen: v5e
topology: v5e:2x2
jax: 0.10.0
libtpu: 0.0.40
codegen_flags: <defaults>
</compile_context>

<pallas_src>
import functools

import jax
import jax.numpy as jnp
from jax import lax
from jax.experimental import pallas as pl
from jax.experimental.pallas import tpu as pltpu


def _tcn_fused_kernel(*refs, layer_cfg, seg_len, n_valid_lanes):
    # refs = (x_ref, w0_0, w1_0, b_0, ..., w0_{K-1}, w1_{K-1}, b_{K-1}, o_ref)
    #   x_ref : (C_in, LANES)    bf16  -- batch packed on lanes, lane j = n*seg_len + t
    #   w0/w1 : (C_out, C_in)    bf16  -- the two kernel taps of the k=2 conv
    #   b     : (C_out, 1)       f32
    #   o_ref : (C_last, LANES)  bf16
    x_ref = refs[0]
    o_ref = refs[-1]
    lanes = x_ref.shape[-1]

    h = x_ref[...].astype(jnp.float32)                 # (C, LANES) f32 working value

    for i, (p, s, l_valid, l_out) in enumerate(layer_cfg):
        w0_ref = refs[1 + 3 * i]
        w1_ref = refs[2 + 3 * i]
        b_ref = refs[3 + 3 * i]

        c_in = h.shape[0]
        j = lax.broadcasted_iota(jnp.int32, (c_in, lanes), 1)
        t = j % seg_len                                 # position within batch segment
        in_seg = j < n_valid_lanes                      # real (non-pad) lanes

        # tap0[:, n*L + t] = x[n, :, t - p]   (zero for t < p : left zero-padding)
        if p > 0:
            tap0 = jnp.where(in_seg & (t >= p), pltpu.roll(h, shift=p, axis=1), 0.0)
        else:
            tap0 = jnp.where(in_seg, h, 0.0)
        # tap1[:, n*L + t] = x[n, :, t + s]   (zero for t + s >= l_valid : right pad)
        tap1 = jnp.where(in_seg & (t + s < l_valid),
                         pltpu.roll(h, shift=lanes - s, axis=1), 0.0)

        # Two accumulating MXU dots (bf16 operands, f32 accumulate); no concat/slice.
        y = jnp.dot(w0_ref[...], tap0.astype(w0_ref.dtype),
                    preferred_element_type=jnp.float32)
        y = y + jnp.dot(w1_ref[...], tap1.astype(w1_ref.dtype),
                        preferred_element_type=jnp.float32)
        y = jnp.maximum(y + b_ref[...], 0.0)            # bias + ReLU in f32

        # Keep a constant lane width: zero the dead tail columns instead of slicing.
        c_out = y.shape[0]
        jo = lax.broadcasted_iota(jnp.int32, (c_out, lanes), 1)
        h = jnp.where((jo < n_valid_lanes) & ((jo % seg_len) < l_out), y, 0.0)

    o_ref[...] = h.astype(o_ref.dtype)


def prepare_tcn_params(params, compute_dtype=jnp.bfloat16):
    """One-time parameter preprocessing (hoisted out of the forward pass).

    params: list of (w, b) with w: (C_out, C_in, 2) effective (weight-norm-folded)
    conv weights, b: (C_out,).  Returns per-layer (w_tap0, w_tap1, bias[:,None]).
    """
    prepared = []
    for w, b in params:
        prepared.append((jnp.asarray(w[:, :, 0], compute_dtype),
                         jnp.asarray(w[:, :, 1], compute_dtype),
                         jnp.asarray(b, jnp.float32)[:, None]))
    return tuple(prepared)


def base_tcn_forward(x, prepared_params, dilation_base=2, compute_dtype=jnp.bfloat16):
    """Fused BaseTCN forward.

    x: (N, C_in, L).  prepared_params: output of prepare_tcn_params.
    Layer i uses dilation = dilation_base**i, padding = (k-1)*dilation//2
    (PyTorch Conv1d semantics), followed by ReLU.  Returns (N, C_last, L_final).
    """
    N, c_in, L = x.shape
    n_layers = len(prepared_params)
    dilations = tuple(dilation_base ** i for i in range(n_layers))

    # Static per-layer config: (pad, tap1 shift, valid input len, valid output len).
    layer_cfg = []
    lv = L
    for d in dilations:
        p = d // 2
        s = d - p
        lo = lv + 2 * p - d
        layer_cfg.append((p, s, lv, lo))
        lv = lo
    l_final = lv
    c_last = prepared_params[-1][0].shape[0]

    nl = N * L
    lanes = max(128, pl.cdiv(nl, 128) * 128)

    # Pack batch onto lanes (lane-dense working layout), zero-pad to 128-multiple.
    x_p = x.astype(compute_dtype).transpose(1, 0, 2).reshape(c_in, nl)
    x_p = jnp.pad(x_p, ((0, 0), (0, lanes - nl)))

    flat_params = []
    in_specs = [pl.BlockSpec((c_in, lanes), lambda i: (0, 0))]
    for w0, w1, b2 in prepared_params:
        flat_params += [w0, w1, b2]
        in_specs.append(pl.BlockSpec(w0.shape, lambda i: (0, 0)))
        in_specs.append(pl.BlockSpec(w1.shape, lambda i: (0, 0)))
        in_specs.append(pl.BlockSpec(b2.shape, lambda i: (0, 0)))

    kernel = functools.partial(_tcn_fused_kernel, layer_cfg=tuple(layer_cfg),
                               seg_len=L, n_valid_lanes=nl)

    out = pl.pallas_call(
        kernel,
        out_shape=jax.ShapeDtypeStruct((c_last, lanes), compute_dtype),
        grid=(1,),                                     # single step: whole batch at once
        in_specs=in_specs,
        out_specs=pl.BlockSpec((c_last, lanes), lambda i: (0, 0)),
        compiler_params=pltpu.CompilerParams(dimension_semantics=("arbitrary",)),
    )(x_p, *flat_params)

    # Lane-dense kernel output -> PyTorch (N, C_out, L_out) layout (layout plumbing).
    out = out[:, :nl].reshape(c_last, N, L)[:, :, :l_final]
    return out.transpose(1, 0, 2)


def make_weightnorm_conv_params(key, in_ch, out_ch, ksize):
    """Deterministic synthetic weight_norm(Conv1d) params.

    Effective weight = g * v / ||v||_(dims 1,2); at torch init g = ||v||, so the
    effective weight equals v, but compute explicitly to mirror the semantics.
    """
    kv, kb = jax.random.split(key)
    v = jax.random.normal(kv, (out_ch, in_ch, ksize), jnp.float32) * 0.1
    g = jnp.sqrt(jnp.sum(v * v, axis=(1, 2)))
    norm = jnp.sqrt(jnp.sum(v * v, axis=(1, 2), keepdims=True))
    w = g[:, None, None] * v / norm
    b = jax.random.normal(kb, (out_ch,), jnp.float32) * 0.1
    return w, b


def _reference_forward(x, params, dilation_base=2):
    # Pure-JAX f32 reference (lax conv) to sanity-check the Pallas kernel.
    h = x
    for i, (w, b) in enumerate(params):
        d = dilation_base ** i
        pad = (2 - 1) * d // 2
        hp = jnp.pad(h, ((0, 0), (0, 0), (pad, pad)))
        y = lax.conv_general_dilated(
            hp, w, window_strides=(1,), padding="VALID",
            rhs_dilation=(d,), dimension_numbers=("NCH", "OIH", "NCH"))
        h = jnp.maximum(y + b[None, :, None], 0.0)
    return h


if __name__ == "__main__":
    key = jax.random.PRNGKey(0)

    # BaseTCN(input_channels=4, num_channels=[8, 16], kernel_size=2, dilation_base=2)
    input_channels = 4
    num_channels = (8, 16)
    kernel_size = 2
    dilation_base = 2

    k_x, k_p = jax.random.split(key)
    N, L = 2, 16
    x = jax.random.normal(k_x, (N, input_channels, L), jnp.float32)

    params = []
    in_ch = input_channels
    keys = jax.random.split(k_p, len(num_channels))
    for i, out_ch in enumerate(num_channels):
        w, b = make_weightnorm_conv_params(keys[i], in_ch, out_ch, kernel_size)
        params.append((w, b))
        in_ch = out_ch

    # One-time parameter preprocessing (hoisted out of the forward pass).
    prepared = prepare_tcn_params(params)
    fwd = jax.jit(functools.partial(base_tcn_forward, dilation_base=dilation_base))

    out = fwd(x, prepared)
    out = jax.block_until_ready(out)

    ref = _reference_forward(x, params, dilation_base=dilation_base)
    assert out.shape == ref.shape, (out.shape, ref.shape)
    # bf16 activations/weights with f32 accumulation -> relaxed tolerance vs f32 ref.
    assert jnp.allclose(out.astype(jnp.float32), ref, atol=2e-2, rtol=2e-2), \
        "mismatch vs lax reference"

    print("KERNEL_OK")
</pallas_src>

<mosaic_0001>
module attributes {stable_mosaic.version = 11 : i64} {
  func.func @_tcn_fused_kernel(%arg0: i32, %arg1: memref<4x128xbf16, #tpu.memory_space<vmem>>, %arg2: memref<8x4xbf16, #tpu.memory_space<vmem>>, %arg3: memref<8x4xbf16, #tpu.memory_space<vmem>>, %arg4: memref<8x1xf32, #tpu.memory_space<vmem>>, %arg5: memref<16x8xbf16, #tpu.memory_space<vmem>>, %arg6: memref<16x8xbf16, #tpu.memory_space<vmem>>, %arg7: memref<16x1xf32, #tpu.memory_space<vmem>>, %arg8: memref<16x128xbf16, #tpu.memory_space<vmem>>) attributes {dimension_semantics = [#tpu.dimension_semantics<arbitrary>], iteration_bounds = array<i64: 1>, scalar_prefetch = 0 : i64, scratch_operands = 0 : i64, tpu.core_type = #tpu.core_type<tc>, window_params = [{pipeline_mode = #tpu.pipeline_mode<synchronous>, transform_indices = @transform_0, window_bounds = array<i64: 4, 128>}, {pipeline_mode = #tpu.pipeline_mode<synchronous>, transform_indices = @transform_1, window_bounds = array<i64: 8, 4>}, {pipeline_mode = #tpu.pipeline_mode<synchronous>, transform_indices = @transform_2, window_bounds = array<i64: 8, 4>}, {pipeline_mode = #tpu.pipeline_mode<synchronous>, transform_indices = @transform_3, window_bounds = array<i64: 8, 1>}, {pipeline_mode = #tpu.pipeline_mode<synchronous>, transform_indices = @transform_4, window_bounds = array<i64: 16, 8>}, {pipeline_mode = #tpu.pipeline_mode<synchronous>, transform_indices = @transform_5, window_bounds = array<i64: 16, 8>}, {pipeline_mode = #tpu.pipeline_mode<synchronous>, transform_indices = @transform_6, window_bounds = array<i64: 16, 1>}, {pipeline_mode = #tpu.pipeline_mode<synchronous>, transform_indices = @transform_7, window_bounds = array<i64: 16, 128>}]} {
    %c0 = arith.constant 0 : index
    %c0_0 = arith.constant 0 : index
    %0 = vector.load %arg1[%c0, %c0_0] : memref<4x128xbf16, #tpu.memory_space<vmem>>, vector<4x128xbf16>
    %1 = arith.extf %0 : vector<4x128xbf16> to vector<4x128xf32>
    %2 = tpu.iota {dimensions = array<i32: 1>} : vector<4x128xi32>
    %c16_i32 = arith.constant 16 : i32
    %c0_i32 = arith.constant 0 : i32
    %3 = arith.cmpi eq, %c16_i32, %c0_i32 : i32
    %c1_i32 = arith.constant 1 : i32
    %4 = arith.select %3, %c1_i32, %c16_i32 : i32
    %5 = vector.broadcast %4 : i32 to vector<4x128xi32>
    %6 = arith.remsi %2, %5 : vector<4x128xi32>
    %c0_i32_1 = arith.constant 0 : i32
    %7 = vector.broadcast %c0_i32_1 : i32 to vector<4x128xi32>
    %8 = arith.cmpi ne, %6, %7 : vector<4x128xi32>
    %c0_i32_2 = arith.constant 0 : i32
    %9 = vector.broadcast %c0_i32_2 : i32 to vector<4x128xi32>
    %10 = arith.cmpi slt, %6, %9 : vector<4x128xi32>
    %c0_i32_3 = arith.constant 0 : i32
    %11 = arith.cmpi slt, %4, %c0_i32_3 : i32
    %12 = vector.broadcast %11 : i1 to vector<4x128xi1>
    %13 = vector.broadcast %12 : vector<4x128xi1> to vector<4x128xi1>
    %14 = arith.xori %10, %13 : vector<4x128xi1>
    %15 = arith.andi %14, %8 : vector<4x128xi1>
    %16 = vector.broadcast %4 : i32 to vector<4x128xi32>
    %17 = arith.addi %6, %16 : vector<4x128xi32>
    %18 = arith.select %15, %17, %6 : vector<4x128xi1>, vector<4x128xi32>
    %c32_i32 = arith.constant 32 : i32
    %19 = vector.broadcast %c32_i32 : i32 to vector<4x128xi32>
    %20 = arith.cmpi slt, %2, %19 : vector<4x128xi32>
    %cst = arith.constant 0.000000e+00 : f32
    %21 = vector.broadcast %cst : f32 to vector<4x128xf32>
    %22 = arith.select %20, %1, %21 : vector<4x128xi1>, vector<4x128xf32>
    %c1_i32_4 = arith.constant 1 : i32
    %23 = vector.broadcast %c1_i32_4 : i32 to vector<4x128xi32>
    %24 = arith.addi %18, %23 : vector<4x128xi32>
    %c16_i32_5 = arith.constant 16 : i32
    %25 = vector.broadcast %c16_i32_5 : i32 to vector<4x128xi32>
    %26 = arith.cmpi slt, %24, %25 : vector<4x128xi32>
    %27 = arith.andi %20, %26 : vector<4x128xi1>
    %c127_i32 = arith.constant 127 : i32
    %28 = tpu.dynamic_rotate %1 by %c127_i32 dim 1 : vector<4x128xf32>, i32 -> vector<4x128xf32>
    %cst_6 = arith.constant 0.000000e+00 : f32
    %29 = vector.broadcast %cst_6 : f32 to vector<4x128xf32>
    %30 = arith.select %27, %28, %29 : vector<4x128xi1>, vector<4x128xf32>
    %c0_7 = arith.constant 0 : index
    %c0_8 = arith.constant 0 : index
    %31 = vector.load %arg2[%c0_7, %c0_8] : memref<8x4xbf16, #tpu.memory_space<vmem>>, vector<8x4xbf16>
    %32 = arith.truncf %22 : vector<4x128xf32> to vector<4x128xbf16>
    %cst_9 = arith.constant dense<0.000000e+00> : vector<8x128xf32>
    %33 = tpu.matmul %31, %32, %cst_9 {dimension_numbers = #tpu.dot_dimension_numbers<[1], [0], [0], [1], [0, 0, 1, 1], [], []>} : vector<8x4xbf16>, vector<4x128xbf16>, vector<8x128xf32> -> vector<8x128xf32>
    %c0_10 = arith.constant 0 : index
    %c0_11 = arith.constant 0 : index
    %34 = vector.load %arg3[%c0_10, %c0_11] : memref<8x4xbf16, #tpu.memory_space<vmem>>, vector<8x4xbf16>
    %35 = arith.truncf %30 : vector<4x128xf32> to vector<4x128xbf16>
    %cst_12 = arith.constant dense<0.000000e+00> : vector<8x128xf32>
    %36 = tpu.matmul %34, %35, %cst_12 {dimension_numbers = #tpu.dot_dimension_numbers<[1], [0], [0], [1], [0, 0, 1, 1], [], []>} : vector<8x4xbf16>, vector<4x128xbf16>, vector<8x128xf32> -> vector<8x128xf32>
    %37 = arith.addf %33, %36 : vector<8x128xf32>
    %c0_13 = arith.constant 0 : index
    %c0_14 = arith.constant 0 : index
    %38 = vector.load %arg4[%c0_13, %c0_14] : memref<8x1xf32, #tpu.memory_space<vmem>>, vector<8x1xf32>
    %39 = vector.broadcast %38 : vector<8x1xf32> to vector<8x128xf32>
    %40 = arith.addf %37, %39 : vector<8x128xf32>
    %cst_15 = arith.constant 0.000000e+00 : f32
    %41 = vector.broadcast %cst_15 : f32 to vector<8x128xf32>
    %42 = arith.maximumf %40, %41 : vector<8x128xf32>
    %43 = tpu.iota {dimensions = array<i32: 1>} : vector<8x128xi32>
    %c32_i32_16 = arith.constant 32 : i32
    %44 = vector.broadcast %c32_i32_16 : i32 to vector<8x128xi32>
    %45 = arith.cmpi slt, %43, %44 : vector<8x128xi32>
    %c16_i32_17 = arith.constant 16 : i32
    %c0_i32_18 = arith.constant 0 : i32
    %46 = arith.cmpi eq, %c16_i32_17, %c0_i32_18 : i32
    %c1_i32_19 = arith.constant 1 : i32
    %47 = arith.select %46, %c1_i32_19, %c16_i32_17 : i32
    %48 = vector.broadcast %47 : i32 to vector<8x128xi32>
    %49 = arith.remsi %43, %48 : vector<8x128xi32>
    %c0_i32_20 = arith.constant 0 : i32
    %50 = vector.broadcast %c0_i32_20 : i32 to vector<8x128xi32>
    %51 = arith.cmpi ne, %49, %50 : vector<8x128xi32>
    %c0_i32_21 = arith.constant 0 : i32
    %52 = vector.broadcast %c0_i32_21 : i32 to vector<8x128xi32>
    %53 = arith.cmpi slt, %49, %52 : vector<8x128xi32>
    %c0_i32_22 = arith.constant 0 : i32
    %54 = arith.cmpi slt, %47, %c0_i32_22 : i32
    %55 = vector.broadcast %54 : i1 to vector<8x128xi1>
    %56 = vector.broadcast %55 : vector<8x128xi1> to vector<8x128xi1>
    %57 = arith.xori %53, %56 : vector<8x128xi1>
    %58 = arith.andi %57, %51 : vector<8x128xi1>
    %59 = vector.broadcast %47 : i32 to vector<8x128xi32>
    %60 = arith.addi %49, %59 : vector<8x128xi32>
    %61 = arith.select %58, %60, %49 : vector<8x128xi1>, vector<8x128xi32>
    %c15_i32 = arith.constant 15 : i32
    %62 = vector.broadcast %c15_i32 : i32 to vector<8x128xi32>
    %63 = arith.cmpi slt, %61, %62 : vector<8x128xi32>
    %64 = arith.andi %45, %63 : vector<8x128xi1>
    %cst_23 = arith.constant 0.000000e+00 : f32
    %65 = vector.broadcast %cst_23 : f32 to vector<8x128xf32>
    %66 = arith.select %64, %42, %65 : vector<8x128xi1>, vector<8x128xf32>
    %67 = tpu.iota {dimensions = array<i32: 1>} : vector<8x128xi32>
    %c16_i32_24 = arith.constant 16 : i32
    %c0_i32_25 = arith.constant 0 : i32
    %68 = arith.cmpi eq, %c16_i32_24, %c0_i32_25 : i32
    %c1_i32_26 = arith.constant 1 : i32
    %69 = arith.select %68, %c1_i32_26, %c16_i32_24 : i32
    %70 = vector.broadcast %69 : i32 to vector<8x128xi32>
    %71 = arith.remsi %67, %70 : vector<8x128xi32>
    %c0_i32_27 = arith.constant 0 : i32
    %72 = vector.broadcast %c0_i32_27 : i32 to vector<8x128xi32>
    %73 = arith.cmpi ne, %71, %72 : vector<8x128xi32>
    %c0_i32_28 = arith.constant 0 : i32
    %74 = vector.broadcast %c0_i32_28 : i32 to vector<8x128xi32>
    %75 = arith.cmpi slt, %71, %74 : vector<8x128xi32>
    %c0_i32_29 = arith.constant 0 : i32
    %76 = arith.cmpi slt, %69, %c0_i32_29 : i32
    %77 = vector.broadcast %76 : i1 to vector<8x128xi1>
    %78 = vector.broadcast %77 : vector<8x128xi1> to vector<8x128xi1>
    %79 = arith.xori %75, %78 : vector<8x128xi1>
    %80 = arith.andi %79, %73 : vector<8x128xi1>
    %81 = vector.broadcast %69 : i32 to vector<8x128xi32>
    %82 = arith.addi %71, %81 : vector<8x128xi32>
    %83 = arith.select %80, %82, %71 : vector<8x128xi1>, vector<8x128xi32>
    %c32_i32_30 = arith.constant 32 : i32
    %84 = vector.broadcast %c32_i32_30 : i32 to vector<8x128xi32>
    %85 = arith.cmpi slt, %67, %84 : vector<8x128xi32>
    %c1_i32_31 = arith.constant 1 : i32
    %86 = vector.broadcast %c1_i32_31 : i32 to vector<8x128xi32>
    %87 = arith.cmpi sge, %83, %86 : vector<8x128xi32>
    %88 = arith.andi %85, %87 : vector<8x128xi1>
    %c1_i32_32 = arith.constant 1 : i32
    %89 = tpu.dynamic_rotate %66 by %c1_i32_32 dim 1 : vector<8x128xf32>, i32 -> vector<8x128xf32>
    %cst_33 = arith.constant 0.000000e+00 : f32
    %90 = vector.broadcast %cst_33 : f32 to vector<8x128xf32>
    %91 = arith.select %88, %89, %90 : vector<8x128xi1>, vector<8x128xf32>
    %c1_i32_34 = arith.constant 1 : i32
    %92 = vector.broadcast %c1_i32_34 : i32 to vector<8x128xi32>
    %93 = arith.addi %83, %92 : vector<8x128xi32>
    %c15_i32_35 = arith.constant 15 : i32
    %94 = vector.broadcast %c15_i32_35 : i32 to vector<8x128xi32>
    %95 = arith.cmpi slt, %93, %94 : vector<8x128xi32>
    %96 = arith.andi %85, %95 : vector<8x128xi1>
    %c127_i32_36 = arith.constant 127 : i32
    %97 = tpu.dynamic_rotate %66 by %c127_i32_36 dim 1 : vector<8x128xf32>, i32 -> vector<8x128xf32>
    %cst_37 = arith.constant 0.000000e+00 : f32
    %98 = vector.broadcast %cst_37 : f32 to vector<8x128xf32>
    %99 = arith.select %96, %97, %98 : vector<8x128xi1>, vector<8x128xf32>
    %c0_38 = arith.constant 0 : index
    %c0_39 = arith.constant 0 : index
    %100 = vector.load %arg5[%c0_38, %c0_39] : memref<16x8xbf16, #tpu.memory_space<vmem>>, vector<16x8xbf16>
    %101 = arith.truncf %91 : vector<8x128xf32> to vector<8x128xbf16>
    %cst_40 = arith.constant dense<0.000000e+00> : vector<16x128xf32>
    %102 = tpu.matmul %100, %101, %cst_40 {dimension_numbers = #tpu.dot_dimension_numbers<[1], [0], [0], [1], [0, 0, 1, 1], [], []>} : vector<16x8xbf16>, vector<8x128xbf16>, vector<16x128xf32> -> vector<16x128xf32>
    %c0_41 = arith.constant 0 : index
    %c0_42 = arith.constant 0 : index
    %103 = vector.load %arg6[%c0_41, %c0_42] : memref<16x8xbf16, #tpu.memory_space<vmem>>, vector<16x8xbf16>
    %104 = arith.truncf %99 : vector<8x128xf32> to vector<8x128xbf16>
    %cst_43 = arith.constant dense<0.000000e+00> : vector<16x128xf32>
    %105 = tpu.matmul %103, %104, %cst_43 {dimension_numbers = #tpu.dot_dimension_numbers<[1], [0], [0], [1], [0, 0, 1, 1], [], []>} : vector<16x8xbf16>, vector<8x128xbf16>, vector<16x128xf32> -> vector<16x128xf32>
    %106 = arith.addf %102, %105 : vector<16x128xf32>
    %c0_44 = arith.constant 0 : index
    %c0_45 = arith.constant 0 : index
    %107 = vector.load %arg7[%c0_44, %c0_45] : memref<16x1xf32, #tpu.memory_space<vmem>>, vector<16x1xf32>
    %108 = vector.broadcast %107 : vector<16x1xf32> to vector<16x128xf32>
    %109 = arith.addf %106, %108 : vector<16x128xf32>
    %cst_46 = arith.constant 0.000000e+00 : f32
    %110 = vector.broadcast %cst_46 : f32 to vector<16x128xf32>
    %111 = arith.maximumf %109, %110 : vector<16x128xf32>
    %112 = tpu.iota {dimensions = array<i32: 1>} : vector<16x128xi32>
    %c32_i32_47 = arith.constant 32 : i32
    %113 = vector.broadcast %c32_i32_47 : i32 to vector<16x128xi32>
    %114 = arith.cmpi slt, %112, %113 : vector<16x128xi32>
    %c16_i32_48 = arith.constant 16 : i32
    %c0_i32_49 = arith.constant 0 : i32
    %115 = arith.cmpi eq, %c16_i32_48, %c0_i32_49 : i32
    %c1_i32_50 = arith.constant 1 : i32
    %116 = arith.select %115, %c1_i32_50, %c16_i32_48 : i32
    %117 = vector.broadcast %116 : i32 to vector<16x128xi32>
    %118 = arith.remsi %112, %117 : vector<16x128xi32>
    %c0_i32_51 = arith.constant 0 : i32
    %119 = vector.broadcast %c0_i32_51 : i32 to vector<16x128xi32>
    %120 = arith.cmpi ne, %118, %119 : vector<16x128xi32>
    %c0_i32_52 = arith.constant 0 : i32
    %121 = vector.broadcast %c0_i32_52 : i32 to vector<16x128xi32>
    %122 = arith.cmpi slt, %118, %121 : vector<16x128xi32>
    %c0_i32_53 = arith.constant 0 : i32
    %123 = arith.cmpi slt, %116, %c0_i32_53 : i32
    %124 = vector.broadcast %123 : i1 to vector<16x128xi1>
    %125 = vector.broadcast %124 : vector<16x128xi1> to vector<16x128xi1>
    %126 = arith.xori %122, %125 : vector<16x128xi1>
    %127 = arith.andi %126, %120 : vector<16x128xi1>
    %128 = vector.broadcast %116 : i32 to vector<16x128xi32>
    %129 = arith.addi %118, %128 : vector<16x128xi32>
    %130 = arith.select %127, %129, %118 : vector<16x128xi1>, vector<16x128xi32>
    %c15_i32_54 = arith.constant 15 : i32
    %131 = vector.broadcast %c15_i32_54 : i32 to vector<16x128xi32>
    %132 = arith.cmpi slt, %130, %131 : vector<16x128xi32>
    %133 = arith.andi %114, %132 : vector<16x128xi1>
    %cst_55 = arith.constant 0.000000e+00 : f32
    %134 = vector.broadcast %cst_55 : f32 to vector<16x128xf32>
    %135 = arith.select %133, %111, %134 : vector<16x128xi1>, vector<16x128xf32>
    %136 = arith.truncf %135 : vector<16x128xf32> to vector<16x128xbf16>
    %c0_56 = arith.constant 0 : index
    %c0_57 = arith.constant 0 : index
    %137 = vector.load %arg8[%c0_56, %c0_57] : memref<16x128xbf16, #tpu.memory_space<vmem>>, vector<16x128xbf16>
    tpu.vector_store %arg8[%c0_56, %c0_57], %136 {strides = array<i32>} : memref<16x128xbf16, #tpu.memory_space<vmem>>, vector<16x128xbf16>,
    return
  }
  func.func @transform_0(%arg0: i32) -> (i32, i32) {
    %c0_i32 = arith.constant 0 : i32
    %c0_i32_0 = arith.constant 0 : i32
    %c0_i32_1 = arith.constant 0 : i32
    return %c0_i32, %c0_i32_0 : i32, i32
  }
  func.func @transform_1(%arg0: i32) -> (i32, i32) {
    %c0_i32 = arith.constant 0 : i32
    %c0_i32_0 = arith.constant 0 : i32
    %c0_i32_1 = arith.constant 0 : i32
    return %c0_i32, %c0_i32_0 : i32, i32
  }
  func.func @transform_2(%arg0: i32) -> (i32, i32) {
    %c0_i32 = arith.constant 0 : i32
    %c0_i32_0 = arith.constant 0 : i32
    %c0_i32_1 = arith.constant 0 : i32
    return %c0_i32, %c0_i32_0 : i32, i32
  }
  func.func @transform_3(%arg0: i32) -> (i32, i32) {
    %c0_i32 = arith.constant 0 : i32
    %c0_i32_0 = arith.constant 0 : i32
    %c0_i32_1 = arith.constant 0 : i32
    return %c0_i32, %c0_i32_0 : i32, i32
  }
  func.func @transform_4(%arg0: i32) -> (i32, i32) {
    %c0_i32 = arith.constant 0 : i32
    %c0_i32_0 = arith.constant 0 : i32
    %c0_i32_1 = arith.constant 0 : i32
    return %c0_i32, %c0_i32_0 : i32, i32
  }
  func.func @transform_5(%arg0: i32) -> (i32, i32) {
    %c0_i32 = arith.constant 0 : i32
    %c0_i32_0 = arith.constant 0 : i32
    %c0_i32_1 = arith.constant 0 : i32
    return %c0_i32, %c0_i32_0 : i32, i32
  }
  func.func @transform_6(%arg0: i32) -> (i32, i32) {
    %c0_i32 = arith.constant 0 : i32
    %c0_i32_0 = arith.constant 0 : i32
    %c0_i32_1 = arith.constant 0 : i32
    return %c0_i32, %c0_i32_0 : i32, i32
  }
  func.func @transform_7(%arg0: i32) -> (i32, i32) {
    %c0_i32 = arith.constant 0 : i32
    %c0_i32_0 = arith.constant 0 : i32
    %c0_i32_1 = arith.constant 0 : i32
    return %c0_i32, %c0_i32_0 : i32, i32
  }
}

</mosaic_0001>

<bundles_post_ra>
// kernel: base_tcn_forward.1
= control target key start
LH: loop header
LB: loop body
LE: loop exit
PB: predicated region body
PF: predicated region fallthrough
CT: control target
= control target key end

     0   :  { %v29_v0 = vlaneseq  ;;  %s224_s26 = smov 127   ;;  %vm59_vm1 = vcmask 1041408   ;;  %vm55_vm2 = vcmask 31744   ;;  %v225_v9 = vmov 0   ;;  %s315_s0 = inlined_call_operand.vmem [shape: bf16[4,128], index: 0, kind: input, shape index: {}]   ;;  %s316_s1 = inlined_call_operand.vmem [shape: bf16[8,4], index: 1, kind: input, shape index: {}]   ;;  %s317_s3 = inlined_call_operand.vmem [shape: f32[8,1], index: 3, kind: input, shape index: {}]   ;;  %s318_s2 = inlined_call_operand.vmem [shape: bf16[8,4], index: 2, kind: input, shape index: {}]   ;;  %s319_s6 = inlined_call_operand.vmem [shape: f32[16,1], index: 6, kind: input, shape index: {}]   ;;  %s320_s4 = inlined_call_operand.vmem [shape: bf16[16,8], index: 4, kind: input, shape index: {}]   ;;  %s321_s5 = inlined_call_operand.vmem [shape: bf16[16,8], index: 5, kind: input, shape index: {}]   ;;  %s322_s7 = inlined_call_operand.vmem [shape: bf16[16,128], index: 7, kind: output, shape index: {}]  }
   0x1   :  { %v27_v1 = vld [vmem:[%s315_s0] sm:$0x3]  ;;  %222 = vset.pattern.permute.xlu0 %v225_v9  ;;  %223 = vset.pattern.permute.xlu2 %v225_v9  ;;  %v175_v28 = vld [vmem:[%s319_s6 + $0x8] sm:$0xff]  ;;  %vm131_vm9 = vcmask 1043456   ;;  %vm127_vm11 = vcmask 64512  }
   0x2   :  { %v28_v2 = vunpack.c.l.bf16 %v27_v1  ;;  %v30_v3 = vand.u32 127, %v29_v0  ;;  %v51_v7 = vld [vmem:[%s316_s1] sm:$0xf] }
   0x3   :  { %v95_v8 = vld [vmem:[%s317_s3] sm:$0xff] }
   0x4   :  { %48 = vrot.lane.b32.xlu0 %v28_v2, %s224_s26  ;;  %vm43_vm0 = vcmp.lt.s32.totalorder %v30_v3, 32  ;;  %v35_v10 = vand.u32 15, %v30_v3  ;;  %v53_v16 = vld [vmem:[%s318_s2] sm:$0xf]  ;;  %s226_s2 = smov 1  }
   0x5   :  { %v44_v4 = vsel %vm43_vm0, %v28_v2, 0.0  ;;  %v174_v27 = vld [vmem:[%s319_s6] sm:$0xff] }
   0x6   :  { %v52_v5 = vpack.c.bf16 %v44_v4, %v44_v4  ;;  %v45_v11 = vadd.s32 1, %v35_v10  ;;  %vm103_vm5 = vcmp.lt.s32.totalorder %v35_v10, 15  ;;  %178 = vperm.xlu2 %223, %v174_v27   ;;  %vm106_vm7 = vcmp.ge.s32.totalorder %v35_v10, 1  ;;  %v212_v33 = vld [vmem:[%s320_s4] sm:$0xff] }
   0x7   :  { %vm287_vm6 = vmand %vm43_vm0, %vm103_vm5  ;;  %v213_v38 = vld [vmem:[%s321_s5] sm:$0xff] }
   0x8   :  { %v80_v6 = vsel %vm59_vm1, %v52_v5, 0  ;;  %vm46_vm3 = vcmp.lt.s32.totalorder %v45_v11, 16  ;;  %vm107_vm8 = vmand %vm43_vm0, %vm106_vm7  ;;  %vm111_vm10 = vcmp.lt.s32.totalorder %v45_v11, 15 }
   0x9   :  { %89 = vmatpush.bf16.msra.mxu1 %v80_v6  ;;  %vm47_vm4 = vmand %vm43_vm0, %vm46_vm3 }
   0xa   :  { %vm112_vm12 = vmand %vm43_vm0, %vm111_vm10 }
   0xc   :  { %201 = vmatmul.msk.bf16.vlgmr.msra.gmra.mxu1 %vm55_vm2, %v51_v7  ;;  %98 = vperm.xlu0 %222, %v95_v8  }
   0xe   :  { %183 = vperm.xlu2 %223, %v175_v28  }
  0x60   :  { %v179_v40 = vpop.permute.xlu2 %178 }
  0x68   :  { %v184_v47 = vpop.permute.xlu2 %183 }
  0x76   :  { %v49_v12 = vpop.permute.xlu0 %48 }
  0x77   :  { %v50_v13 = vsel %vm47_vm4, %v49_v12, 0.0 }
  0x78   :  { %v54_v14 = vpack.c.bf16 %v50_v13, %v50_v13 }
  0x7a   :  { %v61_v15 = vsel %vm59_vm1, %v54_v14, 0 }
  0x7b   :  { %70 = vmatpush.bf16.msra.mxu0 %v61_v15 }
  0x7e   :  { %200 = vmatmul.msk.bf16.vlgmr.msra.gmra.mxu0 %vm55_vm2, %v53_v16  ;;  %v99_v20 = vpop.permute.xlu0 %98 }
  0x89   :  { %v91_v17 = vpop.f32.mrf.mxu1 }
  0x91   :  { %v93_v18 = vpop.f32.mrf.mxu1 }
  0xfb   :  { %v72_v19 = vpop.f32.mrf.mxu0 }
  0xfc   :  { %v92_v21 = vadd.f32 %v91_v17, %v72_v19 }
  0xfe   :  { %v101_v22 = vadd.f32 %v99_v20, %v92_v21 }
 0x100   :  { %v102_v24 = vmax.f32 %v101_v22, 0.0 }
 0x102   :  { %v105_v25 = vsel %vm287_vm6, %v102_v24, 0.0 }
 0x103   :  { %v74_v26 = vpop.f32.mrf.mxu0  ;;  %108 = vrot.lane.b32.xlu1 %v105_v25, %s226_s2 }
 0x10b   :  { %113 = vrot.lane.b32.xlu1 %v105_v25, %s224_s26 }
 0x175   :  { %v109_v29 = vpop.permute.xlu1 %108 }
 0x176   :  { %v110_v30 = vsel %vm107_vm8, %v109_v29, 0.0 }
 0x177   :  { %v118_v31 = vpack.c.bf16 %v110_v30, %v110_v30 }
 0x179   :  { %v158_v32 = vsel %vm131_vm9, %v118_v31, 0 }
 0x17a   :  { %167 = vmatpush.bf16.msra.mxu3 %v158_v32 }
 0x17d   :  { %211 = vmatmul.msk.bf16.vlgmr.msra.gmra.mxu3 %vm127_vm11, %v212_v33  ;;  %v114_v34 = vpop.permute.xlu1 %113 }
 0x17e   :  { %v115_v35 = vsel %vm112_vm12, %v114_v34, 0.0 }
 0x17f   :  { %v121_v36 = vpack.c.bf16 %v115_v35, %v115_v35 }
 0x181   :  { %v133_v37 = vsel %vm131_vm9, %v121_v36, 0 }
 0x182   :  { %142 = vmatpush.bf16.msra.mxu2 %v133_v37 }
 0x185   :  { %206 = vmatmul.msk.bf16.vlgmr.msra.gmra.mxu2 %vm127_vm11, %v213_v38 }
 0x200   :  { %v169_v39 = vpop.f32.mrf.mxu3 }
 0x208   :  { %v144_v41 = vpop.f32.mrf.mxu2  ;;  %v171_v44 = vpop.f32.mrf.mxu3 }
 0x209   :  { %v170_v42 = vadd.f32 %v169_v39, %v144_v41 }
 0x20b   :  { %v186_v43 = vadd.f32 %v179_v40, %v170_v42 }
 0x20d   :  { %v188_v48 = vmax.f32 %v186_v43, 0.0 }
 0x20f   :  { %v190_v51 = vsel %vm287_vm6, %v188_v48, 0.0 }
 0x210   :  { %v146_v45 = vpop.f32.mrf.mxu2 }
 0x211   :  { %v172_v46 = vadd.f32 %v171_v44, %v146_v45 }
 0x213   :  { %v187_v49 = vadd.f32 %v184_v47, %v172_v46 }
 0x215   :  { %v189_v50 = vmax.f32 %v187_v49, 0.0 }
 0x217   :  { %v191_v52 = vsel %vm287_vm6, %v189_v50, 0.0 }
 0x218   :  { %v217_v53 = vpack.c.bf16 %v191_v52, %v190_v51 }
 0x21a   :  { %218 = vst [vmem:[%s322_s7] sm:$0xff] %v217_v53  }

</bundles_post_ra>
